<compile_context>
chip_gen: v6e
topology: v6e:2x2x1
jax: 0.10.0
libtpu: 0.0.40
codegen_flags: <defaults>
</compile_context>

<pallas_src>
import jax
import jax.numpy as jnp
from jax.experimental import pallas as pl
from jax.experimental.pallas import tpu as pltpu

IN_DIM = 1024


def _round_up(v, m):
    return ((v + m - 1) // m) * m


def _linear_kernel(x_ref, w_ref, b_ref, o_ref):
    # Fused cast: x arrives as f32 (4 B/elem of HBM traffic only), cast to bf16
    # on the VPU right before the MXU.  Whole K=1024 strip is resident, so the
    # output tile is produced in a single step — no accumulator, no reduction.
    x = x_ref[...].astype(jnp.bfloat16)
    o_ref[...] = (
        jnp.dot(x, w_ref[...], preferred_element_type=jnp.float32) + b_ref[...]
    ).astype(o_ref.dtype)


def _tile_plan(M, n_pad):
    """Pick (tm, tn).  tm multiple of 16; tn lane-dense (128 multiple)."""
    # N tile: keep the whole padded N resident when small (weight read once),
    # otherwise the largest lane-dense tile that divides n_pad.
    if n_pad <= 512:
        tn = n_pad
    elif n_pad % 512 == 0:
        tn = 512
    elif n_pad % 256 == 0:
        tn = 256
    else:
        tn = 128
    tm = min(512, _round_up(M, 16))

    m_tiles = pl.cdiv(M, tm)
    n_tiles = n_pad // tn
    # v7x has 2 TensorCores: prefer >= 2 parallel grid steps when the shape
    # allows, so the runtime can shard them across cores.
    if m_tiles * n_tiles == 1:
        if n_pad >= 256 and (n_pad // 2) % 128 == 0:
            tn = n_pad // 2
        elif M >= 32:
            tm = _round_up(-(-M // 2), 16)
    return tm, tn


def linear_pallas(x, w_t, b2, out_dim):
    """x: [M, K] f32, w_t: [K, Np] bf16 (pre-transposed/padded), b2: [1, Np] f32."""
    M, K = x.shape
    Kw, Np = w_t.shape
    assert K == Kw == IN_DIM

    tm, tn = _tile_plan(M, Np)
    m_tiles = pl.cdiv(M, tm)
    n_tiles = Np // tn

    # Honest byte counts: x is re-streamed once per N tile; the weight is read
    # exactly once (its block index only changes on the outer grid axis).
    cost = pl.CostEstimate(
        flops=2 * M * K * Np,
        transcendentals=0,
        bytes_accessed=n_tiles * M * K * 4 + K * Np * 2 + Np * 4 + M * Np * 4,
    )

    # Double-buffered VMEM footprint (+ margin); floor at 32 MiB so v5e's
    # 16 MiB default scoped limit never bites, still within v7x's 64 MiB.
    vmem_bytes = 2 * (tm * K * 4 + K * tn * 2 + tn * 4 + tm * tn * 4)
    vmem_limit = max(32 * 1024 * 1024, 2 * vmem_bytes)

    # Grid: N tiles OUTER, M tiles INNER -> weight strip stays VMEM-resident
    # across the whole M sweep (no per-M-tile weight re-stream from HBM).
    return pl.pallas_call(
        _linear_kernel,
        out_shape=jax.ShapeDtypeStruct((M, Np), jnp.float32),
        grid=(n_tiles, m_tiles),
        in_specs=[
            pl.BlockSpec((tm, K), lambda j, i: (i, 0)),   # x strip (full K), f32
            pl.BlockSpec((K, tn), lambda j, i: (0, j)),   # W^T strip, bf16, outer-indexed
            pl.BlockSpec((1, tn), lambda j, i: (0, j)),   # bias tile, f32
        ],
        out_specs=pl.BlockSpec((tm, tn), lambda j, i: (i, j)),
        compiler_params=pltpu.CompilerParams(
            dimension_semantics=("parallel", "parallel"),
            vmem_limit_bytes=vmem_limit,
        ),
        cost_estimate=cost,
    )(x, w_t, b2)


class LastPallas:
    """JAX/Pallas equivalent of the PyTorch `Last` module (Linear(1024, out_dim))."""

    def __init__(self, out_dim, key):
        k_w, k_b = jax.random.split(key)
        bound = 1.0 / jnp.sqrt(IN_DIM)
        # PyTorch stores W as (out_dim, in_dim); keep that for reference math.
        self.weight = jax.random.uniform(
            k_w, (out_dim, IN_DIM), jnp.float32, -bound, bound
        )
        self.bias = jax.random.uniform(k_b, (out_dim,), jnp.float32, -bound, bound)

        # One-time: transpose, pad N to a lane multiple, cast weight to bf16.
        self.out_dim = out_dim
        self.n_pad = _round_up(out_dim, 128)
        w_t = jnp.zeros((IN_DIM, self.n_pad), jnp.float32)
        w_t = w_t.at[:, :out_dim].set(self.weight.T)
        self.w_t = w_t.astype(jnp.bfloat16)
        b2 = jnp.zeros((1, self.n_pad), jnp.float32)
        self.b2 = b2.at[0, :out_dim].set(self.bias)

        self._fwd = jax.jit(self._forward)

    def _forward(self, x):
        # x stays f32; the bf16 cast happens inside the kernel (fused).
        # Ragged M is handled by pl.cdiv grid + masked edge stores — no
        # wrapper-side pad/slice passes over HBM.
        y = linear_pallas(x, self.w_t, self.b2, self.out_dim)
        if self.n_pad != self.out_dim:
            y = y[:, : self.out_dim]
        return y

    def __call__(self, x):
        return self._fwd(x)


if __name__ == "__main__":
    key = jax.random.PRNGKey(0)
    k_x, k_p = jax.random.split(key)

    batch = 8
    out_dim = 128  # Linear(1024, out_dim)
    x = jax.random.normal(k_x, (batch, IN_DIM), jnp.float32)

    model = LastPallas(out_dim, k_p)
    y = jax.block_until_ready(model(x))

    # Correctness check against plain-JAX f32 reference of the PyTorch forward.
    # Tolerance loosened vs. pure-f32 because operands hit the MXU in bf16
    # (intentional precision choice; accumulation and bias add are f32).
    y_ref = x @ model.weight.T + model.bias
    assert y.shape == (batch, out_dim)
    assert jnp.allclose(y, y_ref, atol=5e-2, rtol=5e-2)

    print("KERNEL_OK")
</pallas_src>

<mosaic_0001>
module attributes {stable_mosaic.version = 11 : i64} {
  func.func @_linear_kernel(%arg0: i32, %arg1: i32, %arg2: memref<16x1024xf32, #tpu.memory_space<vmem>>, %arg3: memref<1024x128xbf16, #tpu.memory_space<vmem>>, %arg4: memref<1x128xf32, #tpu.memory_space<vmem>>, %arg5: memref<16x128xf32, #tpu.memory_space<vmem>>) attributes {dimension_semantics = [#tpu.dimension_semantics<parallel>, #tpu.dimension_semantics<parallel>], iteration_bounds = array<i64: 1, 1>, scalar_prefetch = 0 : i64, scratch_operands = 0 : i64, tpu.core_type = #tpu.core_type<tc>, window_params = [{transform_indices = @transform_0, window_bounds = array<i64: 16, 1024>}, {transform_indices = @transform_1, window_bounds = array<i64: 1024, 128>}, {transform_indices = @transform_2, window_bounds = array<i64: 1, 128>}, {transform_indices = @transform_3, window_bounds = array<i64: 16, 128>}]} {
    %c0 = arith.constant 0 : index
    %c0_0 = arith.constant 0 : index
    %0 = vector.load %arg2[%c0, %c0_0] : memref<16x1024xf32, #tpu.memory_space<vmem>>, vector<16x1024xf32>
    %1 = arith.truncf %0 : vector<16x1024xf32> to vector<16x1024xbf16>
    %c0_1 = arith.constant 0 : index
    %c0_2 = arith.constant 0 : index
    %2 = vector.load %arg3[%c0_1, %c0_2] : memref<1024x128xbf16, #tpu.memory_space<vmem>>, vector<1024x128xbf16>
    %cst = arith.constant dense<0.000000e+00> : vector<16x128xf32>
    %3 = tpu.matmul %1, %2, %cst {dimension_numbers = #tpu.dot_dimension_numbers<[1], [0], [0], [1], [0, 0, 1, 1], [], []>} : vector<16x1024xbf16>, vector<1024x128xbf16>, vector<16x128xf32> -> vector<16x128xf32>
    %c0_3 = arith.constant 0 : index
    %c0_4 = arith.constant 0 : index
    %4 = vector.load %arg4[%c0_3, %c0_4] : memref<1x128xf32, #tpu.memory_space<vmem>>, vector<1x128xf32>
    %5 = vector.broadcast %4 : vector<1x128xf32> to vector<16x128xf32>
    %6 = arith.addf %3, %5 : vector<16x128xf32>
    %c0_5 = arith.constant 0 : index
    %c0_6 = arith.constant 0 : index
    %7 = vector.load %arg5[%c0_5, %c0_6] : memref<16x128xf32, #tpu.memory_space<vmem>>, vector<16x128xf32>
    tpu.vector_store %arg5[%c0_5, %c0_6], %6 {strides = array<i32>} : memref<16x128xf32, #tpu.memory_space<vmem>>, vector<16x128xf32>,
    return
  }
  func.func @transform_0(%arg0: i32, %arg1: i32) -> (i32, i32) {
    %c0_i32 = arith.constant 0 : i32
    %c0_i32_0 = arith.constant 0 : i32
    return %arg1, %c0_i32 : i32, i32
  }
  func.func @transform_1(%arg0: i32, %arg1: i32) -> (i32, i32) {
    %c0_i32 = arith.constant 0 : i32
    %c0_i32_0 = arith.constant 0 : i32
    return %c0_i32, %arg0 : i32, i32
  }
  func.func @transform_2(%arg0: i32, %arg1: i32) -> (i32, i32) {
    %c0_i32 = arith.constant 0 : i32
    %c0_i32_0 = arith.constant 0 : i32
    return %c0_i32, %arg0 : i32, i32
  }
  func.func @transform_3(%arg0: i32, %arg1: i32) -> (i32, i32) {
    %c0_i32 = arith.constant 0 : i32
    return %arg1, %arg0 : i32, i32
  }
}

</mosaic_0001>

<bundles_post_ra>
// kernel: _forward.1
= control target key start
LH: loop header
LB: loop body
LE: loop exit
PB: predicated region body
PF: predicated region fallthrough
CT: control target
= control target key end

     0   :  { %8 = vsyncpa [#allocation3], 0  ;;  %s1102_s0 = inlined_call_operand.hbm [shape: f32[8,1024], index: 0, kind: input, shape index: {}]   ;;  %s1103_s1 = inlined_call_operand.hbm [shape: bf16[1024,128], index: 1, kind: input, shape index: {}]   ;;  %s1104_s2 = inlined_call_operand.vmem [shape: f32[1,128], index: 2, kind: input, shape index: {}]   ;;  %s1105_s3 = inlined_call_operand.hbm [shape: f32[8,128], index: 3, kind: output, shape index: {}]  }
   0x1   :  { %9 = vsyncpa [#allocation6], 0 }
   0x2   :  { %10 = vsyncpa [#allocation4], 0 }
   0x3   :  { %15 = vsyncadd [#allocation3], 1024  ;;  %s1062_s12 = smov [#allocation2]  }
   0x4   :  { %s16_s13 = sshll.u32 %s1062_s12, 4  ;;  %s17_s13 = int_to_ptr.vmem [resolvable:$true] %s16_s13 }
   0x5   :  { %s1004_s14 = scalar_lea.vmem %s17_s13, 1024  ;;  %s1008_s15 = scalar_lea.vmem %s17_s13, 2048 }
   0x6   :  { %p1005_p0 = scmp.ne.s32.totalorder %s17_s13, %s1004_s14  ;;  %p1009_p1 = scmp.lt.s32.totalorder %s17_s13, %s17_s13 }
   0x7   :  { %p1010_p2 = scmp.lt.s32.totalorder %s1008_s15, %s1004_s14 }
   0x9   :  { %p1011_p3 = por %p1010_p2, %p1009_p1 }
   0xb   :  { %p1012_p4 = pnand %p1011_p3, %p1005_p0 }
   0xd   :  { %1015 = shalt.err (!%p1012_p4)
}
   0xe   :  { %s1063_s16 = smov 1024   ;;  %s1064_s17 = smov 64  }
   0xf   :  { %22 = dma.hbm_to_vmem [thread:$0]  %s1102_s0, 1024, %s17_s13, [#allocation3], %s1063_s16, %s1063_s16, %s1064_s17  }
  0x10   :  { %s1065_s20 = smov [#allocation5]  }
  0x11   :  { %s28_s21 = sshll.u32 %s1065_s20, 4  ;;  %s29_s21 = int_to_ptr.vmem [resolvable:$true] %s28_s21 }
  0x12   :  { %s1024_s22 = scalar_lea.vmem %s29_s21, 8192  ;;  %p1029_p6 = scmp.lt.s32.totalorder %s29_s21, %s29_s21 }
  0x13   :  { %p1025_p5 = scmp.ne.s32.totalorder %s29_s21, %s1024_s22  ;;  %p1030_p7 = scmp.lt.s32.totalorder %s1024_s22, %s1024_s22 }
  0x15   :  { %p1031_p8 = por %p1030_p7, %p1029_p6 }
  0x17   :  { %p1032_p9 = pnand %p1031_p8, %p1025_p5 }
  0x19   :  { %1035 = shalt.err (!%p1032_p9)
}
  0x1a   :  { %s1066_s23 = smov 4  }
  0x1b   :  { %34 = dma.hbm_to_vmem [thread:$0]  %s1103_s1, 8192, %s29_s21, [#allocation6], %s1064_s17, %s1064_s17, %s1066_s23  }
  0x1c   :  { %1056 = dma.done.wait [#allocation3], 2048  }
  0x1d   :  { %1057 = vsyncadd [#allocation3], 4294965248 }
  0x1e   :  { %1058 = dma.done.wait [#allocation6], 8192  }
  0x1f   :  { %1059 = vsyncadd [#allocation6], 4294959104  ;;  %v932_v0 = vld [vmem:[#allocation5 + $0x78] sm:$0xff]   ;;  %v936_v4 = vld [vmem:[#allocation5 + $0x70] sm:$0xff]  }
  0x20   :  { %v933_v1 = vld [vmem:[#allocation5 + $0xf8] sm:$0xff]   ;;  %836 = vmatprep.subr.bf16.mxu0 %v932_v0  ;;  %v937_v5 = vld [vmem:[#allocation5 + $0xf0] sm:$0xff]   ;;  %v940_v8 = vld [vmem:[#allocation5 + $0x68] sm:$0xff]  }
  0x21   :  { %v934_v2 = vld [vmem:[#allocation5 + $0x38] sm:$0xff]   ;;  %858 = vmatprep.subr.bf16.mxu1 %v933_v1  ;;  %v938_v6 = vld [vmem:[#allocation5 + $0x30] sm:$0xff]   ;;  %v941_v9 = vld [vmem:[#allocation5 + $0xe8] sm:$0xff]  }
  0x22   :  { %v935_v3 = vld [vmem:[#allocation5 + $0xb8] sm:$0xff]   ;;  %837 = vmatpush3.bf16.msra.mxu0 %v934_v2  ;;  %v939_v7 = vld [vmem:[#allocation5 + $0xb0] sm:$0xff]   ;;  %v942_v10 = vld [vmem:[#allocation5 + $0x28] sm:$0xff]  }
  0x23   :  { %859 = vmatpush3.bf16.msra.mxu1 %v935_v3  ;;  %838 = vmatprep.subr.bf16.mxu0 %v936_v4  ;;  %v943_v11 = vld [vmem:[#allocation5 + $0xa8] sm:$0xff]   ;;  %v944_v12 = vld [vmem:[#allocation5 + $0x60] sm:$0xff]   ;;  %v948_v16 = vld [vmem:[#allocation5 + $0x58] sm:$0xff]  }
  0x24   :  { %860 = vmatprep.subr.bf16.mxu1 %v937_v5  ;;  %v945_v13 = vld [vmem:[#allocation5 + $0xe0] sm:$0xff]   ;;  %v949_v17 = vld [vmem:[#allocation5 + $0xd8] sm:$0xff]   ;;  %v952_v20 = vld [vmem:[#allocation5 + $0x50] sm:$0xff]  }
  0x25   :  { %v946_v14 = vld [vmem:[#allocation5 + $0x20] sm:$0xff]   ;;  %v950_v18 = vld [vmem:[#allocation5 + $0x18] sm:$0xff]   ;;  %v953_v21 = vld [vmem:[#allocation5 + $0xd0] sm:$0xff]  }
  0x26   :  { %839 = vmatpush3.bf16.msra.mxu0 %v938_v6  ;;  %v947_v15 = vld [vmem:[#allocation5 + $0xa0] sm:$0xff]   ;;  %v951_v19 = vld [vmem:[#allocation5 + $0x98] sm:$0xff]   ;;  %v954_v22 = vld [vmem:[#allocation5 + $0x10] sm:$0xff]  }
  0x27   :  { %861 = vmatpush3.bf16.msra.mxu1 %v939_v7  ;;  %840 = vmatprep.subr.bf16.mxu0 %v940_v8  ;;  %v955_v23 = vld [vmem:[#allocation5 + $0x90] sm:$0xff]   ;;  %v956_v24 = vld [vmem:[#allocation5 + $0x48] sm:$0xff]   ;;  %v960_v28 = vld [vmem:[#allocation5 + $0x40] sm:$0xff]  }
  0x28   :  { %862 = vmatprep.subr.bf16.mxu1 %v941_v9  ;;  %v957_v25 = vld [vmem:[#allocation5 + $0xc8] sm:$0xff]   ;;  %v961_v29 = vld [vmem:[#allocation5 + $0xc0] sm:$0xff]   ;;  %v47_v34 = vld [vmem:[#allocation2 + $0x18] sm:$0xff] }
  0x29   :  { %v958_v26 = vld [vmem:[#allocation5 + $0x8] sm:$0xff]   ;;  %v962_v30 = vld [vmem:[#allocation5] sm:$0xff]   ;;  %v55_v36 = vld [vmem:[#allocation2 + $0x58] sm:$0xff] }
  0x2a   :  { %841 = vmatpush3.bf16.msra.mxu0 %v942_v10  ;;  %v959_v27 = vld [vmem:[#allocation5 + $0x88] sm:$0xff]   ;;  %v963_v31 = vld [vmem:[#allocation5 + $0x80] sm:$0xff]   ;;  %v63_v39 = vpack.c.bf16 %v55_v36, %v47_v34  ;;  %v46_v41 = vld [vmem:[#allocation2 + $0x10] sm:$0xff] }
  0x2b   :  { %863 = vmatpush3.bf16.msra.mxu1 %v943_v11  ;;  %842 = vmatprep.subr.bf16.mxu0 %v944_v12  ;;  %v45_v32 = vld [vmem:[#allocation2 + $0x8] sm:$0xff]  ;;  %v44_v37 = vld [vmem:[#allocation2] sm:$0xff]  ;;  %v54_v42 = vld [vmem:[#allocation2 + $0x50] sm:$0xff] }
  0x2c   :  { %864 = vmatprep.subr.bf16.mxu1 %v945_v13  ;;  %v53_v33 = vld [vmem:[#allocation2 + $0x48] sm:$0xff]  ;;  %v52_v38 = vld [vmem:[#allocation2 + $0x40] sm:$0xff]  ;;  %v62_v43 = vpack.c.bf16 %v54_v42, %v46_v41  ;;  %v964_v44 = vld [vmem:[#allocation5 + $0x178] sm:$0xff]   ;;  %660 = vmatprep.mubr.bf16.mxu1 %v63_v39 }
  0x2d   :  { %v61_v35 = vpack.c.bf16 %v53_v33, %v45_v32  ;;  %v60_v40 = vpack.c.bf16 %v52_v38, %v44_v37  ;;  %v965_v45 = vld [vmem:[#allocation5 + $0x1f8] sm:$0xff]   ;;  %v968_v48 = vld [vmem:[#allocation5 + $0x170] sm:$0xff]   ;;  %v972_v52 = vld [vmem:[#allocation5 + $0x168] sm:$0xff]  }
  0x2e   :  { %843 = vmatpush3.bf16.msra.mxu0 %v946_v14  ;;  %v966_v46 = vld [vmem:[#allocation5 + $0x138] sm:$0xff]   ;;  %v969_v49 = vld [vmem:[#allocation5 + $0x1f0] sm:$0xff]   ;;  %v973_v53 = vld [vmem:[#allocation5 + $0x1e8] sm:$0xff]  }
  0x2f   :  { %865 = vmatpush3.bf16.msra.mxu1 %v947_v15  ;;  %844 = vmatprep.subr.bf16.mxu0 %v948_v16  ;;  %v967_v47 = vld [vmem:[#allocation5 + $0x1b8] sm:$0xff]   ;;  %v970_v50 = vld [vmem:[#allocation5 + $0x130] sm:$0xff]   ;;  %v974_v54 = vld [vmem:[#allocation5 + $0x128] sm:$0xff]  }
  0x30   :  { %866 = vmatprep.subr.bf16.mxu1 %v949_v17  ;;  %619 = vmatprep.mubr.bf16.mxu0 %v61_v35  ;;  %v971_v51 = vld [vmem:[#allocation5 + $0x1b0] sm:$0xff]   ;;  %v975_v55 = vld [vmem:[#allocation5 + $0x1a8] sm:$0xff]   ;;  %v976_v56 = vld [vmem:[#allocation5 + $0x160] sm:$0xff]  }
  0x31   :  { %v977_v57 = vld [vmem:[#allocation5 + $0x1e0] sm:$0xff]   ;;  %v980_v60 = vld [vmem:[#allocation5 + $0x158] sm:$0xff]   ;;  %v984_v0 = vld [vmem:[#allocation5 + $0x150] sm:$0xff]  }
  0x32   :  { %845 = vmatpush3.bf16.msra.mxu0 %v950_v18  ;;  %v978_v58 = vld [vmem:[#allocation5 + $0x120] sm:$0xff]   ;;  %v981_v61 = vld [vmem:[#allocation5 + $0x1d8] sm:$0xff]   ;;  %v985_v1 = vld [vmem:[#allocation5 + $0x1d0] sm:$0xff]  }
  0x33   :  { %867 = vmatpush3.bf16.msra.mxu1 %v951_v19  ;;  %846 = vmatprep.subr.bf16.mxu0 %v952_v20  ;;  %v979_v59 = vld [vmem:[#allocation5 + $0x1a0] sm:$0xff]   ;;  %v982_v62 = vld [vmem:[#allocation5 + $0x118] sm:$0xff]   ;;  %v986_v2 = vld [vmem:[#allocation5 + $0x110] sm:$0xff]  }
  0x34   :  { %868 = vmatprep.subr.bf16.mxu1 %v953_v21  ;;  %v983_v63 = vld [vmem:[#allocation5 + $0x198] sm:$0xff]   ;;  %v987_v3 = vld [vmem:[#allocation5 + $0x190] sm:$0xff]   ;;  %v988_v4 = vld [vmem:[#allocation5 + $0x148] sm:$0xff]  }
  0x35   :  { %v989_v5 = vld [vmem:[#allocation5 + $0x1c8] sm:$0xff]   ;;  %v992_v8 = vld [vmem:[#allocation5 + $0x140] sm:$0xff]   ;;  %v51_v14 = vld [vmem:[#allocation2 + $0x38] sm:$0xff] }
  0x36   :  { %847 = vmatpush3.bf16.msra.mxu0 %v954_v22  ;;  %v990_v6 = vld [vmem:[#allocation5 + $0x108] sm:$0xff]   ;;  %v993_v9 = vld [vmem:[#allocation5 + $0x1c0] sm:$0xff]   ;;  %v59_v15 = vld [vmem:[#allocation2 + $0x78] sm:$0xff] }
  0x37   :  { %869 = vmatpush3.bf16.msra.mxu1 %v955_v23  ;;  %848 = vmatprep.subr.bf16.mxu0 %v956_v24  ;;  %v991_v7 = vld [vmem:[#allocation5 + $0x188] sm:$0xff]   ;;  %v994_v10 = vld [vmem:[#allocation5 + $0x100] sm:$0xff]   ;;  %v67_v17 = vpack.c.bf16 %v59_v15, %v51_v14  ;;  %v50_v20 = vld [vmem:[#allocation2 + $0x30] sm:$0xff] }
  0x38   :  { %870 = vmatprep.subr.bf16.mxu1 %v957_v25  ;;  %v995_v11 = vld [vmem:[#allocation5 + $0x180] sm:$0xff]   ;;  %v49_v12 = vld [vmem:[#allocation2 + $0x28] sm:$0xff]  ;;  %v58_v22 = vld [vmem:[#allocation2 + $0x70] sm:$0xff] }
  0x39   :  { %v57_v13 = vld [vmem:[#allocation2 + $0x68] sm:$0xff]  ;;  %v48_v18 = vld [vmem:[#allocation2 + $0x20] sm:$0xff]  ;;  %v66_v23 = vpack.c.bf16 %v58_v22, %v50_v20 }
  0x3a   :  { %849 = vmatpush3.bf16.msra.mxu0 %v958_v26  ;;  %v65_v16 = vpack.c.bf16 %v57_v13, %v49_v12  ;;  %v56_v19 = vld [vmem:[#allocation2 + $0x60] sm:$0xff] }
  0x3b   :  { %871 = vmatpush3.bf16.msra.mxu1 %v959_v27  ;;  %850 = vmatprep.subr.bf16.mxu0 %v960_v28  ;;  %v64_v21 = vpack.c.bf16 %v56_v19, %v48_v18 }
  0x3c   :  { %872 = vmatprep.subr.bf16.mxu1 %v961_v29 }
  0x3e   :  { %851 = vmatpush3.bf16.msra.mxu0 %v962_v30 }
  0x3f   :  { %873 = vmatpush3.bf16.msra.mxu1 %v963_v31  ;;  %880 = vmatprep.subr.bf16.mxu0 %v964_v44  ;;  %v771_v31 = vld [vmem:[%s1104_s2] ss:$0 sm:$0xff] }
  0x40   :  { %902 = vmatprep.subr.bf16.mxu1 %v965_v45 }
  0x41   :  { %620 = vmatmul.mubr.bf16.vlgmr.msra.gmra.mxu0 %v60_v40 }
  0x42   :  { %661 = vmatmul.mubr.bf16.vlgmr.msra.gmra.mxu1 %v62_v43  ;;  %881 = vmatpush3.bf16.msra.mxu0 %v966_v46 }
  0x43   :  { %903 = vmatpush3.bf16.msra.mxu1 %v967_v47  ;;  %882 = vmatprep.subr.bf16.mxu0 %v968_v48 }
  0x44   :  { %904 = vmatprep.subr.bf16.mxu1 %v969_v49  ;;  %701 = vmatprep.mubr.bf16.mxu0 %v65_v16 }
  0x45   :  { %742 = vmatprep.mubr.bf16.mxu1 %v67_v17 }
  0x46   :  { %883 = vmatpush3.bf16.msra.mxu0 %v970_v50 }
  0x47   :  { %905 = vmatpush3.bf16.msra.mxu1 %v971_v51  ;;  %884 = vmatprep.subr.bf16.mxu0 %v972_v52 }
  0x48   :  { %906 = vmatprep.subr.bf16.mxu1 %v973_v53 }
  0x4a   :  { %885 = vmatpush3.bf16.msra.mxu0 %v974_v54 }
  0x4b   :  { %907 = vmatpush3.bf16.msra.mxu1 %v975_v55  ;;  %886 = vmatprep.subr.bf16.mxu0 %v976_v56 }
  0x4c   :  { %908 = vmatprep.subr.bf16.mxu1 %v977_v57 }
  0x4e   :  { %887 = vmatpush3.bf16.msra.mxu0 %v978_v58 }
  0x4f   :  { %909 = vmatpush3.bf16.msra.mxu1 %v979_v59  ;;  %888 = vmatprep.subr.bf16.mxu0 %v980_v60 }
  0x50   :  { %910 = vmatprep.subr.bf16.mxu1 %v981_v61 }
  0x52   :  { %889 = vmatpush3.bf16.msra.mxu0 %v982_v62 }
  0x53   :  { %911 = vmatpush3.bf16.msra.mxu1 %v983_v63  ;;  %890 = vmatprep.subr.bf16.mxu0 %v984_v0 }
  0x54   :  { %912 = vmatprep.subr.bf16.mxu1 %v985_v1 }
  0x56   :  { %891 = vmatpush3.bf16.msra.mxu0 %v986_v2 }
  0x57   :  { %913 = vmatpush3.bf16.msra.mxu1 %v987_v3  ;;  %892 = vmatprep.subr.bf16.mxu0 %v988_v4 }
  0x58   :  { %914 = vmatprep.subr.bf16.mxu1 %v989_v5 }
  0x5a   :  { %893 = vmatpush3.bf16.msra.mxu0 %v990_v6 }
  0x5b   :  { %915 = vmatpush3.bf16.msra.mxu1 %v991_v7  ;;  %894 = vmatprep.subr.bf16.mxu0 %v992_v8 }
  0x5c   :  { %916 = vmatprep.subr.bf16.mxu1 %v993_v9 }
  0x5e   :  { %895 = vmatpush3.bf16.msra.mxu0 %v994_v10 }
  0x5f   :  { %917 = vmatpush3.bf16.msra.mxu1 %v995_v11 }
  0x61   :  { %702 = vmatmul.mubr.bf16.vlgmr.msra.gmra.mxu0 %v64_v21 }
  0x62   :  { %743 = vmatmul.mubr.bf16.vlgmr.msra.gmra.mxu1 %v66_v23 }
 0x101   :  { %v852_v24 = vpop.f32.mrf.mxu0 }
 0x102   :  { %v874_v25 = vpop.f32.mrf.mxu1 }
 0x103   :  { %v853_v26 = vpop.f32.mrf.mxu0 }
 0x104   :  { %v875_v27 = vpop.f32.mrf.mxu1  ;;  %v854_v29 = vadd.f32 %v853_v26, %v852_v24 }
 0x105   :  { %v855_v28 = vpop.f32.mrf.mxu0  ;;  %v876_v34 = vadd.f32 %v875_v27, %v874_v25 }
 0x106   :  { %v877_v30 = vpop.f32.mrf.mxu1  ;;  %v622_v33 = vadd.f32 %v854_v29, %v771_v31 }
 0x107   :  { %v856_v32 = vpop.f32.mrf.mxu0 }
 0x108   :  { %v857_v35 = vadd.f32 %v856_v32, %v855_v28  ;;  %v878_v36 = vpop.f32.mrf.mxu1  ;;  %v663_v40 = vadd.f32 %v876_v34, %v622_v33 }
 0x109   :  { %v879_v45 = vadd.f32 %v878_v36, %v877_v30 }
 0x10a   :  { %v625_v41 = vadd.f32 %v857_v35, %v771_v31 }
 0x10c   :  { %v666_v50 = vadd.f32 %v879_v45, %v625_v41 }
 0x121   :  { %v896_v37 = vpop.f32.mrf.mxu0 }
 0x122   :  { %v918_v38 = vpop.f32.mrf.mxu1 }
 0x123   :  { %v897_v39 = vpop.f32.mrf.mxu0 }
 0x124   :  { %v898_v42 = vadd.f32 %v897_v39, %v896_v37  ;;  %v919_v43 = vpop.f32.mrf.mxu1 }
 0x125   :  { %v899_v44 = vpop.f32.mrf.mxu0  ;;  %v920_v47 = vadd.f32 %v919_v43, %v918_v38 }
 0x126   :  { %v704_v46 = vadd.f32 %v898_v42, %v663_v40  ;;  %v921_v48 = vpop.f32.mrf.mxu1 }
 0x127   :  { %v900_v49 = vpop.f32.mrf.mxu0 }
 0x128   :  { %v745_v51 = vadd.f32 %v920_v47, %v704_v46  ;;  %v901_v52 = vadd.f32 %v900_v49, %v899_v44  ;;  %v922_v53 = vpop.f32.mrf.mxu1 }
 0x129   :  { %v923_v55 = vadd.f32 %v922_v53, %v921_v48 }
 0x12a   :  { %751 = vst [vmem:[#allocation7] sm:$0xff] %v745_v51  ;;  %v707_v54 = vadd.f32 %v901_v52, %v666_v50 }
 0x12c   :  { %v748_v56 = vadd.f32 %v923_v55, %v707_v54 }
 0x12e   :  { %752 = vst [vmem:[#allocation7 + $0x8] sm:$0xff] %v748_v56 }
 0x12f   :  { %757 = vsyncadd [#allocation4], 128  ;;  %s1067_s2 = smov [#allocation7]  }
 0x130   :  { %s758_s26 = sshll.u32 %s1067_s2, 4  ;;  %s759_s26 = int_to_ptr.vmem [resolvable:$true] %s758_s26 }
 0x131   :  { %s1036_s27 = scalar_lea.vmem %s759_s26, 128  ;;  %s1040_s28 = scalar_lea.vmem %s759_s26, 256 }
 0x132   :  { %p1037_p10 = scmp.ne.s32.totalorder %s759_s26, %s1036_s27  ;;  %p1041_p11 = scmp.lt.s32.totalorder %s759_s26, %s759_s26 }
 0x133   :  { %p1042_p12 = scmp.lt.s32.totalorder %s1040_s28, %s1036_s27 }
 0x135   :  { %p1043_p13 = por %p1042_p12, %p1041_p11 }
 0x137   :  { %p1044_p0 = pnand %p1043_p13, %p1037_p10 }
 0x139   :  { %1047 = shalt.err (!%p1044_p0)
}
 0x13a   :  { %s1068_s29 = smov 128   ;;  %s1069_s30 = smov 8  }
 0x13b   :  { %764 = dma.vmem_to_hbm [thread:$0]  %s759_s26, 128, %s1105_s3, [#allocation4], %s1068_s29, %s1068_s29, %s1069_s30  }
 0x13c   :  { %1060 = dma.done.wait [#allocation4], 256  }
 0x13d   :  { %1061 = vsyncadd [#allocation4], 4294967040 }
 0x13e   :  { %768 = vsyncpa [#allocation3], 1 }
 0x13f   :  { %769 = vsyncpa [#allocation6], 1 }
 0x140   :  { %770 = vsyncpa [#allocation4], 1 }

</bundles_post_ra>
